<compile_context>
chip_gen: v7x
topology: tpu7x:2x2x1
jax: 0.10.0
libtpu: 0.0.40
codegen_flags: <defaults>
</compile_context>

<pallas_src>
import jax
import jax.numpy as jnp
from jax.experimental import pallas as pl
from jax.experimental.pallas import tpu as pltpu

C = 3           # module-level constant from the PyTorch source
EPS = 1e-4      # eps1 == eps2
K = 5           # conv kernel size
STRIDE = 2
PAD = 2
KK = K * K      # 25 taps
KP = KK + 1     # 25 taps + ones row (bias folded into the matmul)
NC_FULL = 17    # 8 real + 8 imag + 1 lowpass
NC_OUT = 9      # 1 lowpass + 8 magnitude


# ----------------------------- Pallas kernel ------------------------------- #
def _stage_kernel(pt_ref, wt_ref, out_ref):
    """One tile of one stage: fused conv (single MXU matmul) + complex magnitude.

    pt_ref : (KP, TM)       taps (+ ones row) x output-rows   [lane-dense]
    wt_ref : (NC_FULL, KP)  rows = [real(8), imag(8), lowpass(1)], col 25 = bias
    out_ref: (NC_OUT, TM)   row 0 = lowpass, rows 1..8 = magnitude
    """
    full = jnp.dot(wt_ref[...], pt_ref[...],
                   preferred_element_type=jnp.float32)          # (17, TM)
    re = full[0:8, :]
    im = full[8:16, :]
    lp = full[16:17, :]
    mag = jnp.sqrt(re * re + im * im + EPS)                     # (8, TM)
    out_ref[...] = jnp.concatenate([lp, mag], axis=0)           # (9, TM)


# ------------------------------- glue -------------------------------------- #
def _pick_tm(m):
    """Multiple of 128, <= 1024 rows/step, >= 2 grid steps when possible (v7x)."""
    tm = pl.cdiv(m, 2 * 128) * 128
    return int(max(128, min(1024, tm)))


def _im2col_t(x, Ho, Wo):
    """x: (B, H, W) single-channel -> transposed patch matrix (26, B*Ho*Wo).

    Rows 0..24 are the 25 taps (stride 2, pad 2); row 25 is ones (bias term).
    Columns are ordered (b, oh, ow)."""
    B = x.shape[0]
    xp = jnp.pad(x, ((0, 0), (PAD, PAD), (PAD, PAD)))
    rows = []
    for ki in range(K):
        for kj in range(K):
            rows.append(xp[:, ki:ki + STRIDE * Ho:STRIDE,
                            kj:kj + STRIDE * Wo:STRIDE].reshape(1, -1))
    rows.append(jnp.ones((1, B * Ho * Wo), x.dtype))
    return jnp.concatenate(rows, axis=0)                        # (26, M)


def _pack_weights(w_lp, b_lp, w_re, b_re, w_im, b_im):
    """PyTorch conv weights -> one packed (17, 26) matrix (last column = bias)."""
    wt = jnp.concatenate([w_re.reshape(8, KK),
                          w_im.reshape(8, KK),
                          w_lp.reshape(1, KK)], axis=0)         # (17, 25)
    bt = jnp.concatenate([b_re, b_im, b_lp], axis=0).reshape(NC_FULL, 1)
    return jnp.concatenate([wt, bt], axis=1)                    # (17, 26)


def _stage(x, wt):
    """One stage. x: (B, H, W) -> (9, B, Ho, Wo)  (channel-major; ch0 = lowpass)."""
    B, H, W = x.shape
    Ho = (H + 2 * PAD - K) // STRIDE + 1
    Wo = (W + 2 * PAD - K) // STRIDE + 1
    M = B * Ho * Wo
    TM = _pick_tm(M)
    Mp = pl.cdiv(M, TM) * TM

    pt = _im2col_t(x, Ho, Wo)                                   # (26, M)
    pt = jnp.pad(pt, ((0, 0), (0, Mp - M)))                     # (26, Mp)

    cost = pl.CostEstimate(
        flops=2 * Mp * KP * NC_FULL + 4 * Mp * 8,
        transcendentals=Mp * 8,
        bytes_accessed=4 * (KP * Mp + NC_FULL * KP + NC_OUT * Mp),
    )

    out = pl.pallas_call(
        _stage_kernel,
        out_shape=jax.ShapeDtypeStruct((NC_OUT, Mp), jnp.float32),
        grid_spec=pltpu.PrefetchScalarGridSpec(
            num_scalar_prefetch=0,
            grid=(Mp // TM,),
            in_specs=[
                pl.BlockSpec((KP, TM), lambda i: (0, i)),        # patches^T
                pl.BlockSpec((NC_FULL, KP), lambda i: (0, 0)),   # packed W | b
            ],
            out_specs=pl.BlockSpec((NC_OUT, TM), lambda i: (0, i)),
        ),
        compiler_params=pltpu.CompilerParams(
            dimension_semantics=("parallel",)),
        cost_estimate=cost,
    )(pt, wt)                                                   # (9, Mp)

    return out[:, :M].reshape(NC_OUT, B, Ho, Wo)


def model_forward(x, params):
    """x: (N, C, H, W) float32 -> (N, 81*C, H//4, W//4)."""
    N, Cc, H, W = x.shape
    wt1 = _pack_weights(*params["conv1_lowpass"], *params["conv1_real"],
                        *params["conv1_imag"])
    wt2 = _pack_weights(*params["conv2_lowpass"], *params["conv2_real"],
                        *params["conv2_imag"])

    imgs = x.reshape(N * Cc, H, W)                              # view(-1, 1, H, W)
    s1 = _stage(imgs, wt1)                                      # (9, N*C, H/2, W/2)
    _, B1, H2, W2 = s1.shape
    # Stage 2 treats every (ch1, image) pair as an independent single-channel
    # image; this reshape is a free view (no NCHW relayout between stages).
    s2 = _stage(s1.reshape(9 * B1, H2, W2), wt2)                # (9, 9*N*C, H/4, W/4)
    _, _, H4, W4 = s2.shape

    # Axes of s2: (ch2, ch1, n, c, h, w)  ->  PyTorch order (n, c, ch1, ch2, h, w)
    s2 = s2.reshape(9, 9, N, Cc, H4, W4)
    out = jnp.transpose(s2, (2, 3, 1, 0, 4, 5))
    return out.reshape(-1, 81 * C, H4, W4)


# ------------------------ parameters (deterministic) ------------------------ #
def init_params(key):
    names = ["conv1_lowpass", "conv1_real", "conv1_imag",
             "conv2_lowpass", "conv2_real", "conv2_imag"]
    couts = [1, 8, 8, 1, 8, 8]
    ks = jax.random.split(key, 2 * len(names))
    params = {}
    bound = 1.0 / (1 * K * K) ** 0.5            # PyTorch default Conv2d init bound
    for i, (n, co) in enumerate(zip(names, couts)):
        w = jax.random.uniform(ks[2 * i], (co, 1, K, K), jnp.float32, -bound, bound)
        b = jax.random.uniform(ks[2 * i + 1], (co,), jnp.float32, -bound, bound)
        params[n] = (w, b)
    return params


# -------------------------- pure-JAX reference ------------------------------ #
def _conv_ref(x, w, b):
    y = jax.lax.conv_general_dilated(
        x, w, window_strides=(STRIDE, STRIDE), padding=((PAD, PAD), (PAD, PAD)),
        dimension_numbers=("NCHW", "OIHW", "NCHW"))
    return y + b.reshape(1, -1, 1, 1)


def model_ref(x, params):
    N, Cc, H, W = x.shape
    out = x.reshape(-1, 1, H, W)
    lp = _conv_ref(out, *params["conv1_lowpass"])
    mag = jnp.sqrt(_conv_ref(out, *params["conv1_real"]) ** 2
                   + _conv_ref(out, *params["conv1_imag"]) ** 2 + EPS)
    out = jnp.concatenate([lp, mag], axis=1)
    out = out.reshape(-1, 1, out.shape[2], out.shape[3])
    lp = _conv_ref(out, *params["conv2_lowpass"])
    mag = jnp.sqrt(_conv_ref(out, *params["conv2_real"]) ** 2
                   + _conv_ref(out, *params["conv2_imag"]) ** 2 + EPS)
    out = jnp.concatenate([lp, mag], axis=1)
    return out.reshape(-1, 81 * C, out.shape[2], out.shape[3])


# ---------------------------------- main ------------------------------------ #
if __name__ == "__main__":
    key = jax.random.PRNGKey(0)
    kx, kp = jax.random.split(key)
    x = jax.random.normal(kx, (2, C, 16, 16), dtype=jnp.float32)
    params = init_params(kp)

    y = jax.jit(model_forward)(x, params)
    y = jax.block_until_ready(y)

    assert y.shape == (2, 81 * C, 4, 4), y.shape
    y_ref = model_ref(x, params)
    assert jnp.allclose(y, y_ref, rtol=1e-5, atol=1e-5), "mismatch vs reference"

    print("KERNEL_OK")
</pallas_src>

<mosaic_0001>
module attributes {stable_mosaic.version = 11 : i64} {
  func.func @_stage_kernel(%arg0: i32, %arg1: memref<26x256xf32, #tpu.memory_space<vmem>>, %arg2: memref<17x26xf32, #tpu.memory_space<vmem>>, %arg3: memref<9x256xf32, #tpu.memory_space<vmem>>) attributes {dimension_semantics = [#tpu.dimension_semantics<parallel>], iteration_bounds = array<i64: 2>, scalar_prefetch = 0 : i64, scratch_operands = 0 : i64, tpu.core_type = #tpu.core_type<tc>, window_params = [{transform_indices = @transform_0, window_bounds = array<i64: 26, 256>}, {pipeline_mode = #tpu.pipeline_mode<synchronous>, transform_indices = @transform_1, window_bounds = array<i64: 17, 26>}, {transform_indices = @transform_2, window_bounds = array<i64: 9, 256>}]} {
    %c0 = arith.constant 0 : index
    %c0_0 = arith.constant 0 : index
    %0 = vector.load %arg2[%c0, %c0_0] : memref<17x26xf32, #tpu.memory_space<vmem>>, vector<17x26xf32>
    %c0_1 = arith.constant 0 : index
    %c0_2 = arith.constant 0 : index
    %1 = vector.load %arg1[%c0_1, %c0_2] : memref<26x256xf32, #tpu.memory_space<vmem>>, vector<26x256xf32>
    %cst = arith.constant dense<0.000000e+00> : vector<17x256xf32>
    %2 = tpu.matmul %0, %1, %cst {dimension_numbers = #tpu.dot_dimension_numbers<[1], [0], [0], [1], [0, 0, 1, 1], [], []>} : vector<17x26xf32>, vector<26x256xf32>, vector<17x256xf32> -> vector<17x256xf32>
    %3 = vector.extract_strided_slice %2 {offsets = [0, 0], sizes = [8, 256], strides = [1, 1]} : vector<17x256xf32> to vector<8x256xf32>
    %4 = vector.extract_strided_slice %2 {offsets = [8, 0], sizes = [8, 256], strides = [1, 1]} : vector<17x256xf32> to vector<8x256xf32>
    %5 = vector.extract_strided_slice %2 {offsets = [16, 0], sizes = [1, 256], strides = [1, 1]} : vector<17x256xf32> to vector<1x256xf32>
    %6 = arith.mulf %3, %3 : vector<8x256xf32>
    %7 = arith.mulf %4, %4 : vector<8x256xf32>
    %8 = arith.addf %6, %7 : vector<8x256xf32>
    %cst_3 = arith.constant 9.99999974E-5 : f32
    %9 = vector.broadcast %cst_3 : f32 to vector<8x256xf32>
    %10 = arith.addf %8, %9 : vector<8x256xf32>
    %11 = math.sqrt %10 : vector<8x256xf32>
    %12 = tpu.concatenate %5, %11 in 0 : vector<1x256xf32>, vector<8x256xf32> -> vector<9x256xf32>
    %c0_4 = arith.constant 0 : index
    %c0_5 = arith.constant 0 : index
    %13 = vector.load %arg3[%c0_4, %c0_5] : memref<9x256xf32, #tpu.memory_space<vmem>>, vector<9x256xf32>
    tpu.vector_store %arg3[%c0_4, %c0_5], %12 {strides = array<i32>} : memref<9x256xf32, #tpu.memory_space<vmem>>, vector<9x256xf32>,
    return
  }
  func.func @transform_0(%arg0: i32) -> (i32, i32) {
    %c0_i32 = arith.constant 0 : i32
    %c0_i32_0 = arith.constant 0 : i32
    return %c0_i32, %arg0 : i32, i32
  }
  func.func @transform_1(%arg0: i32) -> (i32, i32) {
    %c0_i32 = arith.constant 0 : i32
    %c0_i32_0 = arith.constant 0 : i32
    %c0_i32_1 = arith.constant 0 : i32
    return %c0_i32, %c0_i32_0 : i32, i32
  }
  func.func @transform_2(%arg0: i32) -> (i32, i32) {
    %c0_i32 = arith.constant 0 : i32
    %c0_i32_0 = arith.constant 0 : i32
    return %c0_i32, %arg0 : i32, i32
  }
}

module attributes {stable_mosaic.version = 11 : i64} {
  func.func @_stage_kernel(%arg0: i32, %arg1: memref<26x512xf32, #tpu.memory_space<vmem>>, %arg2: memref<17x26xf32, #tpu.memory_space<vmem>>, %arg3: memref<9x512xf32, #tpu.memory_space<vmem>>) attributes {dimension_semantics = [#tpu.dimension_semantics<parallel>], iteration_bounds = array<i64: 2>, scalar_prefetch = 0 : i64, scratch_operands = 0 : i64, tpu.core_type = #tpu.core_type<tc>, window_params = [{transform_indices = @transform_0, window_bounds = array<i64: 26, 512>}, {pipeline_mode = #tpu.pipeline_mode<synchronous>, transform_indices = @transform_1, window_bounds = array<i64: 17, 26>}, {transform_indices = @transform_2, window_bounds = array<i64: 9, 512>}]} {
    %c0 = arith.constant 0 : index
    %c0_0 = arith.constant 0 : index
    %0 = vector.load %arg2[%c0, %c0_0] : memref<17x26xf32, #tpu.memory_space<vmem>>, vector<17x26xf32>
    %c0_1 = arith.constant 0 : index
    %c0_2 = arith.constant 0 : index
    %1 = vector.load %arg1[%c0_1, %c0_2] : memref<26x512xf32, #tpu.memory_space<vmem>>, vector<26x512xf32>
    %cst = arith.constant dense<0.000000e+00> : vector<17x512xf32>
    %2 = tpu.matmul %0, %1, %cst {dimension_numbers = #tpu.dot_dimension_numbers<[1], [0], [0], [1], [0, 0, 1, 1], [], []>} : vector<17x26xf32>, vector<26x512xf32>, vector<17x512xf32> -> vector<17x512xf32>
    %3 = vector.extract_strided_slice %2 {offsets = [0, 0], sizes = [8, 512], strides = [1, 1]} : vector<17x512xf32> to vector<8x512xf32>
    %4 = vector.extract_strided_slice %2 {offsets = [8, 0], sizes = [8, 512], strides = [1, 1]} : vector<17x512xf32> to vector<8x512xf32>
    %5 = vector.extract_strided_slice %2 {offsets = [16, 0], sizes = [1, 512], strides = [1, 1]} : vector<17x512xf32> to vector<1x512xf32>
    %6 = arith.mulf %3, %3 : vector<8x512xf32>
    %7 = arith.mulf %4, %4 : vector<8x512xf32>
    %8 = arith.addf %6, %7 : vector<8x512xf32>
    %cst_3 = arith.constant 9.99999974E-5 : f32
    %9 = vector.broadcast %cst_3 : f32 to vector<8x512xf32>
    %10 = arith.addf %8, %9 : vector<8x512xf32>
    %11 = math.sqrt %10 : vector<8x512xf32>
    %12 = tpu.concatenate %5, %11 in 0 : vector<1x512xf32>, vector<8x512xf32> -> vector<9x512xf32>
    %c0_4 = arith.constant 0 : index
    %c0_5 = arith.constant 0 : index
    %13 = vector.load %arg3[%c0_4, %c0_5] : memref<9x512xf32, #tpu.memory_space<vmem>>, vector<9x512xf32>
    tpu.vector_store %arg3[%c0_4, %c0_5], %12 {strides = array<i32>} : memref<9x512xf32, #tpu.memory_space<vmem>>, vector<9x512xf32>,
    return
  }
  func.func @transform_0(%arg0: i32) -> (i32, i32) {
    %c0_i32 = arith.constant 0 : i32
    %c0_i32_0 = arith.constant 0 : i32
    return %c0_i32, %arg0 : i32, i32
  }
  func.func @transform_1(%arg0: i32) -> (i32, i32) {
    %c0_i32 = arith.constant 0 : i32
    %c0_i32_0 = arith.constant 0 : i32
    %c0_i32_1 = arith.constant 0 : i32
    return %c0_i32, %c0_i32_0 : i32, i32
  }
  func.func @transform_2(%arg0: i32) -> (i32, i32) {
    %c0_i32 = arith.constant 0 : i32
    %c0_i32_0 = arith.constant 0 : i32
    return %c0_i32, %arg0 : i32, i32
  }
}

</mosaic_0001>

<bundles_post_ra>
// kernel: model_forward.2
= control target key start
LH: loop header
LB: loop body
LE: loop exit
PB: predicated region body
PF: predicated region fallthrough
CT: control target
= control target key end

     0   :  { %s516_s9 = smov 0   ;;  %s518_s10 = smov 0   ;;  %s589_s0 = inlined_call_operand.vmem [shape: f32[26,512], index: 0, kind: input, shape index: {}]   ;;  %s590_s1 = inlined_call_operand.vmem [shape: f32[17,26], index: 1, kind: input, shape index: {}]   ;;  %s591_s2 = inlined_call_operand.vmem [shape: f32[9,512], index: 2, kind: output, shape index: {}]  }
   0x1   :  { %s520_s11 = smov 0  }
   0x2 LB: > { %s409_s12 = sadd.s32 4294967295, %s497_s11   ;;  %s533_s13 = sadd.s32 1, %s497_s11   ;;  %s497_s11 = sphi %s520_s11, %s595_s11   ;;  %s493_s10 = sphi %s518_s10, %s594_s10   ;;  %s489_s9 = sphi %s516_s9, %s593_s9  }
   0x3   : > { %s16_s14 = ssub.s32 %s497_s11, %s533_s13  ;;  %s19_s15 = sadd.s32 1, %s493_s10 }
   0x4   : > { %p17_p0 = scmp.eq.s32.totalorder %s16_s14, 0  ;;  %p26_p1 = scmp.ne.s32.totalorder %s493_s10, %s489_s9 }
   0x5   : > { %p27_p2 = scmp.eq.s32.totalorder %s497_s11, 0  ;;  %p77_p3 = scmp.eq.s32.totalorder %s409_s12, 1 }
   0x6   : > { %s544_s16 = scalar_select %p17_p0, %s493_s10, %s19_s15  }
   0x7   : > { %p28_p4 = por %p27_p2, %p26_p1  ;;  %p546_p5 = por %p77_p3, %p26_p1 }
   0x8   : > { %p412_p6 = scmp.ge.s32.totalorder %s497_s11, 2 }
   0xa   : > { %102 = sbr.rel (%p412_p6) target bundleno = 25 (0x19), region = 20 }
  0x11   : > { %105 = sbr.rel (!%p28_p4) target bundleno = 25 (0x19), region = 24  ;;  %s107_s18 = sand.u32 (%p28_p4), 1, %s493_s10  }
  0x12   : > { %s429_s19 = sshll.u32 (%p28_p4), %s497_s11, 4  ;;  %s413_s20 = sshll.u32 (%p28_p4), %s107_s18, 6 }
  0x13   : > { %s112_s23 = scalar_lea.vmem (%p28_p4), %s589_s0, %s429_s19  ;;  %s109_s24 = scalar_lea.vmem (%p28_p4), [#allocation2], %s413_s20 }
  0x14   : > { %v125_v0 = vld [vmem:[%s112_s23] sm:$0xff] (%p28_p4)  ;;  %v127_v1 = vld [vmem:[%s112_s23 + $0x8] sm:$0xff] (%p28_p4) }
  0x15   : > { %v129_v2 = vld [vmem:[%s112_s23 + $0x20] sm:$0xff] (%p28_p4)  ;;  %126 = vst [vmem:[%s109_s24] sm:$0xff] (%p28_p4), %v125_v0  ;;  %128 = vst [vmem:[%s109_s24 + $0x8] sm:$0xff] (%p28_p4), %v127_v1  ;;  %v131_v3 = vld [vmem:[%s112_s23 + $0x28] sm:$0xff] (%p28_p4) }
  0x16   : > { %130 = vst [vmem:[%s109_s24 + $0x10] sm:$0xff] (%p28_p4), %v129_v2  ;;  %v133_v4 = vld [vmem:[%s112_s23 + $0x40] sm:$0xff] (%p28_p4)  ;;  %v135_v5 = vld [vmem:[%s112_s23 + $0x48] sm:$0xff] (%p28_p4)  ;;  %132 = vst [vmem:[%s109_s24 + $0x18] sm:$0xff] (%p28_p4), %v131_v3 }
  0x17   : > { %134 = vst [vmem:[%s109_s24 + $0x20] sm:$0xff] (%p28_p4), %v133_v4  ;;  %136 = vst [vmem:[%s109_s24 + $0x28] sm:$0xff] (%p28_p4), %v135_v5  ;;  %v137_v6 = vld [vmem:[%s112_s23 + $0x60] sm:$0xff] (%p28_p4)  ;;  %v139_v7 = vld [vmem:[%s112_s23 + $0x68] sm:$0xff] (%p28_p4) }
  0x18   : > { %138 = vst [vmem:[%s109_s24 + $0x30] sm:$0xff] %v137_v6  ;;  %140 = vst [vmem:[%s109_s24 + $0x38] sm:$0xff] %v139_v7 }
  0x19 PF: > { %p416_p7 = scmp.ge.s32.totalorder %s497_s11, 1  ;;  %p145_p8 = scmp.lt.s32.totalorder %s497_s11, 3 }
  0x1b   : > { %p146_p9 = pnand %p416_p7, %p145_p8 }
  0x1c   : > { %s152_s25 = sand.u32 (!%p146_p9), 1, %s489_s9   ;;  %v499_v8 = vmov (!%p146_p9), 0.0   ;;  %vm195_vm0 = vcmask (!%p146_p9), 1041408   ;;  %vm500_vm1 = vmmov (!%p146_p9), 1   ;;  %v174_v21 = vld [vmem:[%s590_s1] sm:$0xff] (!%p146_p9)  ;;  %vm185_vm3 = vcmask (!%p146_p9), 211968  }
  0x1d   : > { %149 = sbr.rel (%p146_p9) target bundleno = 288 (0x120), region = 47  ;;  %s417_s26 = sshll.u32 (!%p146_p9), %s152_s25, 6  ;;  %266 = vmatprep.mubr.f32.mxu0 (!%p146_p9), %v499_v8  ;;  %272 = vmatprep.mubr.f32.mxu1 (!%p146_p9), %v499_v8  ;;  %vm436_vm2 = vmpackc.low (!%p146_p9), %vm195_vm0, %vm500_vm1  ;;  %v175_v22 = vld [vmem:[%s590_s1 + $0x8] sm:$0xff] (!%p146_p9)  ;;  %v176_v23 = vld [vmem:[%s590_s1 + $0x10] sm:$0x1] (!%p146_p9)  ;;  %vm313_vm7 = vcmask (!%p146_p9), 1040384  }
  0x1e   : > { %s154_s27 = scalar_lea.vmem (!%p146_p9), [#allocation2], %s417_s26  ;;  %s418_s6 = sshll.u32 (!%p146_p9), %s152_s25, 5 }
  0x1f   : > { %v178_v9 = vld [vmem:[%s154_s27 + $0x8] sm:$0xff] (!%p146_p9)  ;;  %v180_v10 = vld [vmem:[%s154_s27 + $0x18] sm:$0xff] (!%p146_p9)  ;;  %v177_v11 = vld [vmem:[%s154_s27] sm:$0xff] (!%p146_p9)  ;;  %s171_s7 = scalar_lea.vmem (!%p146_p9), [#allocation3], %s418_s6 }
  0x20   : > { %v431_v12 = vpack.c.bf16 (!%p146_p9), %v180_v10, %v178_v9  ;;  %v179_v13 = vld [vmem:[%s154_s27 + $0x10] sm:$0xff] (!%p146_p9)  ;;  %v182_v14 = vld [vmem:[%s154_s27 + $0x28] sm:$0xff] (!%p146_p9)  ;;  %v184_v15 = vld [vmem:[%s154_s27 + $0x38] sm:$0x3] (!%p146_p9) }
  0x21   : > { %v433_v16 = vpack.c.bf16 (!%p146_p9), %v179_v13, %v177_v11  ;;  %v435_v17 = vpack.c.bf16 (!%p146_p9), %v184_v15, %v182_v14  ;;  %v181_v18 = vld [vmem:[%s154_s27 + $0x20] sm:$0xff] (!%p146_p9)  ;;  %v183_v19 = vld [vmem:[%s154_s27 + $0x30] sm:$0x3] (!%p146_p9) }
  0x22   : > { %432 = vmatprep.subr.bf16.mxu0 (!%p146_p9), %v431_v12  ;;  %441 = vmatprep.subr.bf16.mxu1 (!%p146_p9), %v431_v12  ;;  %v438_v20 = vpack.c.bf16 (!%p146_p9), %v183_v19, %v181_v18 }
  0x23   : > { %434 = vmatpush1.bf16.msra.mxu0 (!%p146_p9), %v433_v16  ;;  %443 = vmatpush1.bf16.msra.mxu1 (!%p146_p9), %v433_v16 }
  0x24   : > { %437 = vmatprep.subr.msk.bf16.mxu0 %vm436_vm2, %v435_v17  ;;  %442 = vmatprep.subr.msk.bf16.mxu1 %vm436_vm2, %v435_v17  ;;  %s430_s8 = sshll.u32 (%p546_p5), %s409_s12, 4 }
  0x25   : > { %s329_s15 = scalar_lea.vmem (%p546_p5), %s591_s2, %s430_s8 }
  0x27   : > { %440 = vmatpush1.bf16.msk.msra.mxu0 %vm436_vm2, %v438_v20  ;;  %444 = vmatpush1.bf16.msk.msra.mxu1 %vm436_vm2, %v438_v20 }
  0x2a   : > { %421 = vmatmul.mubr.msk.f32.vlgmr.msra.gmra.mrb[0].mxu0 %vm185_vm3, %v174_v21  ;;  %422 = vmatmul.mubr.msk.f32.vlgmr.msra.gmra.mrb[0].mxu1 %vm185_vm3, %v175_v22 }
  0x2b   : > { %278 = vmatprep.mubr.f32.mxu1 %v499_v8 }
  0x2e   : > { %423 = vmatmul.mubr.msk.f32.gmra.mrb[2].mxu1 %vm185_vm3, %v176_v23 }
  0xfd   : > { %v268_v24 = vpop.f32.mrb[0].mxu0  ;;  %v274_v25 = vpop.f32.mrb[0].mxu1 }
  0xfe   : > { %v285_v26 = vmul.f32 %v268_v24, %v268_v24  ;;  %v287_v27 = vmul.f32 %v274_v25, %v274_v25  ;;  %v270_v28 = vpop.f32.mrb[1].mxu0  ;;  %v276_v29 = vpop.f32.mrb[1].mxu1 }
  0xff   : > { %v286_v30 = vmul.f32 %v270_v28, %v270_v28  ;;  %v288_v31 = vmul.f32 %v276_v29, %v276_v29 }
 0x100   : > { %v289_v32 = vadd.f32 %v287_v27, %v285_v26 }
 0x101   : > { %v290_v33 = vadd.f32 %v288_v31, %v286_v30  ;;  %v280_v34 = vpop.f32.mrb[2].mxu1 }
 0x102   : > { %v291_v35 = vadd.f32 0.0001, %v289_v32  ;;  %v282_v36 = vpop.f32.mrb[3].mxu1 }
 0x103   : > { %v292_v37 = vadd.f32 0.0001, %v290_v33 }
 0x104   : > { %471 = vrsqrt.f32 %v291_v35  ;;  %vm295_vm4 = vcmp.eq.f32.partialorder %v291_v35, inf  ;;  %v298_v41 = vand.u32 2147483648, %v291_v35  ;;  %vm297_vm5 = vcmp.eq.f32.partialorder %v291_v35, 0.0 }
 0x105   : > { %473 = vrsqrt.f32 %v292_v37  ;;  %vm302_vm6 = vcmp.eq.f32.partialorder %v292_v37, inf  ;;  %v305_v44 = vand.u32 2147483648, %v292_v37  ;;  %vm304_vm8 = vcmp.eq.f32.partialorder %v292_v37, 0.0 }
 0x10e   : > { %v472_v38 = vpop.eup %471 }
 0x10f   : > { %v474_v39 = vpop.eup %473  ;;  %v294_v40 = vmul.f32 %v472_v38, %v291_v35 }
 0x110   : > { %v301_v42 = vmul.f32 %v474_v39, %v292_v37 }
 0x111   : > { %v296_v43 = vsel %vm295_vm4, %v291_v35, %v294_v40  ;;  %326 = sbr.rel (!%p546_p5) target bundleno = 288 (0x120), region = 55 }
 0x112   : > { %v299_v45 = vsel %vm297_vm5, %v298_v41, %v296_v43  ;;  %v303_v46 = vsel %vm302_vm6, %v292_v37, %v301_v42 }
 0x113   : > { %v309_v47 = vrot.slane %v299_v45, 7  ;;  %v306_v48 = vsel %vm304_vm8, %v305_v44, %v303_v46 }
 0x114   : > { %v310_v49 = vrot.slane %v306_v48, 7 }
 0x115   : > { %v314_v50 = vsel %vm313_vm7, %v280_v34, %v309_v47  ;;  %318 = vst [vmem:[%s171_s7 + $0x10] sm:$0x1] %v309_v47 }
 0x116   : > { %316 = vst [vmem:[%s171_s7] sm:$0xff] %v314_v50  ;;  %v315_v51 = vsel %vm313_vm7, %v282_v36, %v310_v49  ;;  %319 = vst [vmem:[%s171_s7 + $0x18] sm:$0x1] %v310_v49 }
 0x117   : > { %317 = vst [vmem:[%s171_s7 + $0x8] sm:$0xff] %v315_v51 }
 0x11c   : > { %v346_v54 = vld [vmem:[%s171_s7 + $0x10] sm:$0xff] }
 0x11d   : > { %v342_v52 = vld [vmem:[%s171_s7] sm:$0xff]  ;;  %v348_v55 = vld [vmem:[%s171_s7 + $0x18] sm:$0xff]  ;;  %347 = vst [vmem:[%s329_s15 + $0x20] sm:$0xff] %v346_v54 }
 0x11e   : > { %v344_v53 = vld [vmem:[%s171_s7 + $0x8] sm:$0xff]  ;;  %343 = vst [vmem:[%s329_s15] sm:$0xff] %v342_v52  ;;  %349 = vst [vmem:[%s329_s15 + $0x28] sm:$0xff] %v348_v55 }
 0x11f   : > { %345 = vst [vmem:[%s329_s15 + $0x8] sm:$0xff] %v344_v53 }
 0x120 PF: > { %p9_p10 = scmp.ge.s32.totalorder %s533_s13, 4   ;;  %s593_s9 = smov %s493_s10 }
 0x121   : > { %s594_s10 = smov %s544_s16  ;;  %s595_s11 = smov %s533_s13 }
 0x122   :  { %11 = sbr.rel (!%p9_p10) target bundleno = 2 (0x2), region = 109 }

// kernel: model_forward.3
= control target key start
LH: loop header
LB: loop body
LE: loop exit
PB: predicated region body
PF: predicated region fallthrough
CT: control target
= control target key end

     0   :  { %s686_s9 = smov 0   ;;  %s688_s10 = smov 0   ;;  %s811_s0 = inlined_call_operand.vmem [shape: f32[26,1024], index: 0, kind: input, shape index: {}]   ;;  %s812_s1 = inlined_call_operand.vmem [shape: f32[17,26], index: 1, kind: input, shape index: {}]   ;;  %s813_s2 = inlined_call_operand.vmem [shape: f32[9,1024], index: 2, kind: output, shape index: {}]  }
   0x1   :  { %s690_s11 = smov 0  }
   0x2 LB: > { %s564_s12 = sadd.s32 4294967295, %s667_s11   ;;  %s703_s13 = sadd.s32 1, %s667_s11   ;;  %s667_s11 = sphi %s690_s11, %s819_s11   ;;  %s663_s10 = sphi %s688_s10, %s818_s10   ;;  %s659_s9 = sphi %s686_s9, %s817_s9  }
   0x3   : > { %s16_s14 = ssub.s32 %s667_s11, %s703_s13  ;;  %s19_s15 = sadd.s32 1, %s663_s10 }
   0x4   : > { %p17_p0 = scmp.eq.s32.totalorder %s16_s14, 0  ;;  %p26_p1 = scmp.ne.s32.totalorder %s663_s10, %s659_s9 }
   0x5   : > { %p27_p2 = scmp.eq.s32.totalorder %s667_s11, 0  ;;  %p77_p3 = scmp.eq.s32.totalorder %s564_s12, 1 }
   0x6   : > { %s714_s16 = scalar_select %p17_p0, %s663_s10, %s19_s15  }
   0x7   : > { %p28_p4 = por %p27_p2, %p26_p1  ;;  %p716_p5 = por %p77_p3, %p26_p1 }
   0x8   : > { %p567_p6 = scmp.ge.s32.totalorder %s667_s11, 2 }
   0xa   : > { %102 = sbr.rel (%p567_p6) target bundleno = 29 (0x1d), region = 20 }
  0x11   : > { %105 = sbr.rel (!%p28_p4) target bundleno = 29 (0x1d), region = 24  ;;  %s107_s18 = sand.u32 (%p28_p4), 1, %s663_s10  }
  0x12   : > { %s589_s19 = sshll.u32 (%p28_p4), %s667_s11, 5  ;;  %s568_s20 = sshll.u32 (%p28_p4), %s107_s18, 7 }
  0x13   : > { %s726_s23 = scalar_lea.vmem (%p28_p4), %s811_s0, %s589_s19  ;;  %s109_s24 = scalar_lea.vmem (%p28_p4), [#allocation2], %s568_s20 }
  0x14   : > { %v125_v0 = vld [vmem:[%s726_s23] sm:$0xff] (%p28_p4)  ;;  %v127_v1 = vld [vmem:[%s726_s23 + $0x8] sm:$0xff] (%p28_p4)  ;;  %v129_v2 = vld [vmem:[%s726_s23 + $0x10] sm:$0xff] (%p28_p4) }
  0x15   : > { %126 = vst [vmem:[%s109_s24] sm:$0xff] (%p28_p4), %v125_v0  ;;  %128 = vst [vmem:[%s109_s24 + $0x8] sm:$0xff] (%p28_p4), %v127_v1  ;;  %v131_v3 = vld [vmem:[%s726_s23 + $0x18] sm:$0xff] (%p28_p4)  ;;  %v133_v4 = vld [vmem:[%s726_s23 + $0x40] sm:$0xff] (%p28_p4) }
  0x16   : > { %130 = vst [vmem:[%s109_s24 + $0x10] sm:$0xff] (%p28_p4), %v129_v2  ;;  %v135_v5 = vld [vmem:[%s726_s23 + $0x48] sm:$0xff] (%p28_p4)  ;;  %132 = vst [vmem:[%s109_s24 + $0x18] sm:$0xff] (%p28_p4), %v131_v3  ;;  %v137_v6 = vld [vmem:[%s726_s23 + $0x50] sm:$0xff] (%p28_p4) }
  0x17   : > { %134 = vst [vmem:[%s109_s24 + $0x20] sm:$0xff] (%p28_p4), %v133_v4  ;;  %136 = vst [vmem:[%s109_s24 + $0x28] sm:$0xff] (%p28_p4), %v135_v5  ;;  %v139_v7 = vld [vmem:[%s726_s23 + $0x58] sm:$0xff] (%p28_p4)  ;;  %v141_v8 = vld [vmem:[%s726_s23 + $0x80] sm:$0xff] (%p28_p4) }
  0x18   : > { %138 = vst [vmem:[%s109_s24 + $0x30] sm:$0xff] %v137_v6  ;;  %140 = vst [vmem:[%s109_s24 + $0x38] sm:$0xff] %v139_v7  ;;  %v143_v9 = vld [vmem:[%s726_s23 + $0x88] sm:$0xff]  ;;  %v145_v10 = vld [vmem:[%s726_s23 + $0x90] sm:$0xff] }
  0x19   : > { %142 = vst [vmem:[%s109_s24 + $0x40] sm:$0xff] %v141_v8  ;;  %v147_v11 = vld [vmem:[%s726_s23 + $0x98] sm:$0xff]  ;;  %144 = vst [vmem:[%s109_s24 + $0x48] sm:$0xff] %v143_v9  ;;  %v149_v12 = vld [vmem:[%s726_s23 + $0xc0] sm:$0xff] }
  0x1a   : > { %146 = vst [vmem:[%s109_s24 + $0x50] sm:$0xff] %v145_v10  ;;  %148 = vst [vmem:[%s109_s24 + $0x58] sm:$0xff] %v147_v11  ;;  %v151_v13 = vld [vmem:[%s726_s23 + $0xc8] sm:$0xff]  ;;  %v153_v14 = vld [vmem:[%s726_s23 + $0xd0] sm:$0xff] }
  0x1b   : > { %150 = vst [vmem:[%s109_s24 + $0x60] sm:$0xff] %v149_v12  ;;  %152 = vst [vmem:[%s109_s24 + $0x68] sm:$0xff] %v151_v13  ;;  %v155_v15 = vld [vmem:[%s726_s23 + $0xd8] sm:$0xff] }
  0x1c   : > { %154 = vst [vmem:[%s109_s24 + $0x70] sm:$0xff] %v153_v14  ;;  %156 = vst [vmem:[%s109_s24 + $0x78] sm:$0xff] %v155_v15 }
  0x1d PF: > { %p571_p7 = scmp.ge.s32.totalorder %s667_s11, 1  ;;  %p161_p8 = scmp.lt.s32.totalorder %s667_s11, 3 }
  0x1f   : > { %p162_p9 = pnand %p571_p7, %p161_p8 }
  0x20   : > { %s168_s25 = sand.u32 (!%p162_p9), 1, %s659_s9   ;;  %vm219_vm0 = vcmask (!%p162_p9), 1041408   ;;  %v669_v16 = vmov (!%p162_p9), 0.0   ;;  %vm670_vm1 = vmmov (!%p162_p9), 1   ;;  %v190_v42 = vld [vmem:[%s812_s1] sm:$0xff] (!%p162_p9)  ;;  %vm209_vm3 = vcmask (!%p162_p9), 211968  }
  0x21   : > { %165 = sbr.rel (%p162_p9) target bundleno = 299 (0x12b), region = 47  ;;  %s572_s26 = sshll.u32 (!%p162_p9), %s168_s25, 7  ;;  %296 = vmatprep.mubr.f32.mxu0 (!%p162_p9), %v669_v16  ;;  %379 = vmatprep.mubr.f32.mxu1 (!%p162_p9), %v669_v16  ;;  %vm749_vm2 = vmpackc.low (!%p162_p9), %vm219_vm0, %vm670_vm1  ;;  %v191_v43 = vld [vmem:[%s812_s1 + $0x8] sm:$0xff] (!%p162_p9)  ;;  %v192_v44 = vld [vmem:[%s812_s1 + $0x10] sm:$0x1] (!%p162_p9)  ;;  %vm454_vm5 = vcmask (!%p162_p9), 1040384  }
  0x22   : > { %s170_s27 = scalar_lea.vmem (!%p162_p9), [#allocation2], %s572_s26  ;;  %s573_s6 = sshll.u32 (!%p162_p9), %s168_s25, 6 }
  0x23   : > { %v194_v18 = vld [vmem:[%s170_s27 + $0x8] sm:$0xff] (!%p162_p9)  ;;  %v196_v20 = vld [vmem:[%s170_s27 + $0x18] sm:$0xff] (!%p162_p9)  ;;  %v193_v23 = vld [vmem:[%s170_s27] sm:$0xff] (!%p162_p9)  ;;  %s773_s7 = scalar_lea.vmem (!%p162_p9), [#allocation3], %s573_s6 }
  0x24   : > { %v198_v19 = vld [vmem:[%s170_s27 + $0x28] sm:$0xff] (!%p162_p9)  ;;  %v200_v22 = vld [vmem:[%s170_s27 + $0x38] sm:$0xff] (!%p162_p9)  ;;  %v197_v24 = vld [vmem:[%s170_s27 + $0x20] sm:$0xff] (!%p162_p9) }
  0x25   : > { %v591_v21 = vpack.c.bf16 (!%p162_p9), %v198_v19, %v194_v18  ;;  %v601_v25 = vpack.c.bf16 (!%p162_p9), %v200_v22, %v196_v20  ;;  %v593_v26 = vpack.c.bf16 (!%p162_p9), %v197_v24, %v193_v23  ;;  %v195_v27 = vld [vmem:[%s170_s27 + $0x10] sm:$0xff] (!%p162_p9)  ;;  %v202_v29 = vld [vmem:[%s170_s27 + $0x48] sm:$0xff] (!%p162_p9)  ;;  %v204_v32 = vld [vmem:[%s170_s27 + $0x58] sm:$0xff] (!%p162_p9) }
  0x26   : > { %v199_v28 = vld [vmem:[%s170_s27 + $0x30] sm:$0xff] (!%p162_p9)  ;;  %v206_v31 = vld [vmem:[%s170_s27 + $0x68] sm:$0x3] (!%p162_p9)  ;;  %v208_v33 = vld [vmem:[%s170_s27 + $0x78] sm:$0x3] (!%p162_p9) }
  0x27   : > { %592 = vmatprep.subr.bf16.mxu0 (!%p162_p9), %v591_v21  ;;  %v603_v30 = vpack.c.bf16 (!%p162_p9), %v199_v28, %v195_v27  ;;  %602 = vmatprep.subr.bf16.mxu1 (!%p162_p9), %v601_v25  ;;  %v595_v34 = vpack.c.bf16 (!%p162_p9), %v206_v31, %v202_v29  ;;  %v605_v35 = vpack.c.bf16 (!%p162_p9), %v208_v33, %v204_v32  ;;  %v201_v36 = vld [vmem:[%s170_s27 + $0x40] sm:$0xff] (!%p162_p9)  ;;  %v203_v38 = vld [vmem:[%s170_s27 + $0x50] sm:$0xff] (!%p162_p9) }
  0x28   : > { %594 = vmatpush1.bf16.msra.mxu0 %v593_v26  ;;  %v205_v37 = vld [vmem:[%s170_s27 + $0x60] sm:$0x3]  ;;  %v207_v40 = vld [vmem:[%s170_s27 + $0x70] sm:$0x3]  ;;  %s590_s8 = sshll.u32 (%p716_p5), %s564_s12, 5 }
  0x29   : > { %604 = vmatpush1.bf16.msra.mxu1 %v603_v30  ;;  %v598_v39 = vpack.c.bf16 %v205_v37, %v201_v36  ;;  %597 = vmatprep.subr.msk.bf16.mxu0 %vm749_vm2, %v595_v34  ;;  %v608_v41 = vpack.c.bf16 %v207_v40, %v203_v38  ;;  %s476_s15 = scalar_lea.vmem (%p716_p5), %s813_s2, %s590_s8 }
  0x2a   : > { %607 = vmatprep.subr.msk.bf16.mxu1 %vm749_vm2, %v605_v35 }
  0x2c   : > { %600 = vmatpush1.bf16.msk.msra.mxu0 %vm749_vm2, %v598_v39 }
  0x2d   : > { %610 = vmatpush1.bf16.msk.msra.mxu1 %vm749_vm2, %v608_v41 }
  0x2f   : > { %576 = vmatmul.mubr.msk.f32.vlgmr.msra.gmra.mrb[0].mxu0 %vm209_vm3, %v190_v42 }
  0x30   : > { %581 = vmatmul.mubr.msk.f32.vlgmr.msra.gmra.mrb[0].mxu1 %vm209_vm3, %v190_v42  ;;  %302 = vmatprep.mubr.f32.mxu0 %v669_v16 }
  0x31   : > { %385 = vmatprep.mubr.f32.mxu1 %v669_v16 }
  0x33   : > { %577 = vmatmul.mubr.msk.f32.gmra.mrb[2].mxu0 %vm209_vm3, %v191_v43 }
  0x34   : > { %582 = vmatmul.mubr.msk.f32.gmra.mrb[2].mxu1 %vm209_vm3, %v191_v43  ;;  %308 = vmatprep.mubr.f32.mxu0 %v669_v16 }
  0x35   : > { %391 = vmatprep.mubr.f32.mxu1 %v669_v16 }
  0x37   : > { %578 = vmatmul.mubr.msk.f32.gmra.mrb[4].mxu0 %vm209_vm3, %v192_v44 }
  0x38   : > { %583 = vmatmul.mubr.msk.f32.gmra.mrb[4].mxu1 %vm209_vm3, %v192_v44 }
 0x102   : > { %v298_v45 = vpop.f32.mrb[0].mxu0 }
 0x103   : > { %v381_v46 = vpop.f32.mrb[0].mxu1  ;;  %v300_v47 = vpop.f32.mrb[1].mxu0  ;;  %v398_v50 = vmul.f32 %v298_v45, %v298_v45 }
 0x104   : > { %v383_v48 = vpop.f32.mrb[1].mxu1  ;;  %v400_v54 = vmul.f32 %v381_v46, %v381_v46  ;;  %v399_v55 = vmul.f32 %v300_v47, %v300_v47 }
 0x105   : > { %v401_v59 = vmul.f32 %v383_v48, %v383_v48 }
 0x106   : > { %v304_v49 = vpop.f32.mrb[2].mxu0 }
 0x107   : > { %v402_v51 = vmul.f32 %v304_v49, %v304_v49  ;;  %v387_v52 = vpop.f32.mrb[2].mxu1  ;;  %v306_v53 = vpop.f32.mrb[3].mxu0 }
 0x108   : > { %v404_v56 = vmul.f32 %v387_v52, %v387_v52  ;;  %v403_v57 = vmul.f32 %v306_v53, %v306_v53  ;;  %v389_v58 = vpop.f32.mrb[3].mxu1 }
 0x109   : > { %v406_v60 = vadd.f32 %v402_v51, %v398_v50  ;;  %v405_v61 = vmul.f32 %v389_v58, %v389_v58 }
 0x10a   : > { %v408_v62 = vadd.f32 %v404_v56, %v400_v54  ;;  %v407_v63 = vadd.f32 %v403_v57, %v399_v55  ;;  %v310_v0 = vpop.f32.mrb[4].mxu0 }
 0x10b   : > { %v410_v1 = vadd.f32 0.0001, %v406_v60  ;;  %v409_v2 = vadd.f32 %v405_v61, %v401_v59  ;;  %v393_v3 = vpop.f32.mrb[4].mxu1  ;;  %v312_v4 = vpop.f32.mrb[5].mxu0 }
 0x10c   : > { %v412_v5 = vadd.f32 0.0001, %v408_v62  ;;  %v411_v6 = vadd.f32 0.0001, %v407_v63  ;;  %v395_v7 = vpop.f32.mrb[5].mxu1 }
 0x10d   : > { %637 = vrsqrt.f32 %v410_v1  ;;  %v413_v8 = vadd.f32 0.0001, %v409_v2  ;;  %vm416_vm4 = vcmp.eq.f32.partialorder %v410_v1, inf  ;;  %vm418_vm6 = vcmp.eq.f32.partialorder %v410_v1, 0.0 }
 0x10e   : > { %639 = vrsqrt.f32 %v412_v5  ;;  %v419_v12 = vand.u32 2147483648, %v410_v1  ;;  %vm430_vm7 = vcmp.eq.f32.partialorder %v412_v5, inf  ;;  %vm432_vm8 = vcmp.eq.f32.partialorder %v412_v5, 0.0 }
 0x10f   : > { %641 = vrsqrt.f32 %v411_v6  ;;  %v433_v15 = vand.u32 2147483648, %v412_v5  ;;  %vm423_vm9 = vcmp.eq.f32.partialorder %v411_v6, inf  ;;  %vm425_vm10 = vcmp.eq.f32.partialorder %v411_v6, 0.0 }
 0x110   : > { %643 = vrsqrt.f32 %v413_v8  ;;  %v426_v19 = vand.u32 2147483648, %v411_v6  ;;  %vm437_vm11 = vcmp.eq.f32.partialorder %v413_v8, inf  ;;  %v440_v26 = vand.u32 2147483648, %v413_v8 }
 0x111   : > { %vm439_vm12 = vcmp.eq.f32.partialorder %v413_v8, 0.0 }
 0x117   : > { %v638_v9 = vpop.eup %637 }
 0x118   : > { %v640_v10 = vpop.eup %639  ;;  %v415_v11 = vmul.f32 %v638_v9, %v410_v1 }
 0x119   : > { %v642_v13 = vpop.eup %641  ;;  %v429_v14 = vmul.f32 %v640_v10, %v412_v5 }
 0x11a   : > { %v644_v16 = vpop.eup %643  ;;  %v417_v17 = vsel %vm416_vm4, %v410_v1, %v415_v11  ;;  %v422_v18 = vmul.f32 %v642_v13, %v411_v6 }
 0x11b   : > { %v420_v20 = vsel %vm418_vm6, %v419_v12, %v417_v17  ;;  %v431_v21 = vsel %vm430_vm7, %v412_v5, %v429_v14  ;;  %v436_v22 = vmul.f32 %v644_v16, %v413_v8 }
 0x11c   : > { %v446_v23 = vrot.slane %v420_v20, 7  ;;  %v434_v24 = vsel %vm432_vm8, %v433_v15, %v431_v21  ;;  %v424_v25 = vsel %vm423_vm9, %v411_v6, %v422_v18  ;;  %473 = sbr.rel (!%p716_p5) target bundleno = 299 (0x12b), region = 55 }
 0x11d   : > { %v448_v27 = vrot.slane %v434_v24, 7  ;;  %v427_v28 = vsel %vm425_vm10, %v426_v19, %v424_v25  ;;  %v438_v29 = vsel %vm437_vm11, %v413_v8, %v436_v22 }
 0x11e   : > { %v455_v30 = vsel %vm454_vm5, %v310_v0, %v446_v23  ;;  %463 = vst [vmem:[%s773_s7 + $0x20] sm:$0x1] %v446_v23  ;;  %v447_v31 = vrot.slane %v427_v28, 7  ;;  %v441_v32 = vsel %vm439_vm12, %v440_v26, %v438_v29 }
 0x11f   : > { %459 = vst [vmem:[%s773_s7] sm:$0xff] %v455_v30  ;;  %v457_v33 = vsel %vm454_vm5, %v393_v3, %v448_v27  ;;  %465 = vst [vmem:[%s773_s7 + $0x30] sm:$0x1] %v448_v27  ;;  %v449_v34 = vrot.slane %v441_v32, 7 }
 0x120   : > { %461 = vst [vmem:[%s773_s7 + $0x10] sm:$0xff] %v457_v33  ;;  %v456_v35 = vsel %vm454_vm5, %v312_v4, %v447_v31  ;;  %464 = vst [vmem:[%s773_s7 + $0x28] sm:$0x1] %v447_v31 }
 0x121   : > { %460 = vst [vmem:[%s773_s7 + $0x8] sm:$0xff] %v456_v35  ;;  %v458_v36 = vsel %vm454_vm5, %v395_v7, %v449_v34  ;;  %466 = vst [vmem:[%s773_s7 + $0x38] sm:$0x1] %v449_v34 }
 0x122   : > { %462 = vst [vmem:[%s773_s7 + $0x18] sm:$0xff] %v458_v36 }
 0x125   : > { %v497_v41 = vld [vmem:[%s773_s7 + $0x20] sm:$0xff] }
 0x126   : > { %v489_v37 = vld [vmem:[%s773_s7] sm:$0xff]  ;;  %498 = vst [vmem:[%s476_s15 + $0x40] sm:$0xff] %v497_v41  ;;  %v501_v43 = vld [vmem:[%s773_s7 + $0x30] sm:$0xff] }
 0x127   : > { %v493_v39 = vld [vmem:[%s773_s7 + $0x10] sm:$0xff]  ;;  %v499_v42 = vld [vmem:[%s773_s7 + $0x28] sm:$0xff]  ;;  %490 = vst [vmem:[%s476_s15] sm:$0xff] %v489_v37  ;;  %502 = vst [vmem:[%s476_s15 + $0x50] sm:$0xff] %v501_v43 }
 0x128   : > { %v491_v38 = vld [vmem:[%s773_s7 + $0x8] sm:$0xff]  ;;  %494 = vst [vmem:[%s476_s15 + $0x10] sm:$0xff] %v493_v39  ;;  %500 = vst [vmem:[%s476_s15 + $0x48] sm:$0xff] %v499_v42  ;;  %v503_v44 = vld [vmem:[%s773_s7 + $0x38] sm:$0xff] }
 0x129   : > { %v495_v40 = vld [vmem:[%s773_s7 + $0x18] sm:$0xff]  ;;  %492 = vst [vmem:[%s476_s15 + $0x8] sm:$0xff] %v491_v38  ;;  %504 = vst [vmem:[%s476_s15 + $0x58] sm:$0xff] %v503_v44 }
 0x12a   : > { %496 = vst [vmem:[%s476_s15 + $0x18] sm:$0xff] %v495_v40 }
 0x12b PF: > { %p9_p10 = scmp.ge.s32.totalorder %s703_s13, 4   ;;  %s817_s9 = smov %s663_s10 }
 0x12c   : > { %s818_s10 = smov %s714_s16  ;;  %s819_s11 = smov %s703_s13 }
 0x12d   :  { %11 = sbr.rel (!%p9_p10) target bundleno = 2 (0x2), region = 109 }

</bundles_post_ra>
